<compile_context>
chip_gen: v7x
topology: tpu7x:2x2x1
jax: 0.10.0
libtpu: 0.0.40
codegen_flags: <defaults>
</compile_context>

<pallas_src>
import functools

import jax
import jax.numpy as jnp
from jax import lax
from jax.experimental import pallas as pl
from jax.experimental.pallas import tpu as pltpu


_LANE = 128


def _round_up(x, m):
    return (x + m - 1) // m * m


def _pick_tm(b_pad):
    """Largest multiple-of-16 batch tile <= 512 that divides b_pad.

    Keeps >= 2 grid steps whenever the batch allows it so
    dimension_semantics=("parallel",) can shard across v7x's two TensorCores
    (a no-op on single-TC v5e/v6e).
    """
    max_tm = min(512, b_pad if b_pad < 32 else b_pad // 2)
    tm = 16
    cand = 16
    while cand <= max_tm:
        if b_pad % cand == 0:
            tm = cand
        cand += 16
    return tm


def _pad2(x, rows, cols):
    pr, pc = rows - x.shape[0], cols - x.shape[1]
    if pr == 0 and pc == 0:
        return x  # no-op when already aligned: no extra HBM copy
    return jnp.pad(x, ((0, pr), (0, pc)))


def _syncnet_kernel(img_ref, aud_ref, wi_ref, wa_ref, out_ref):
    # ---- backbone (linear head stand-in) ----
    # Activations arrive f32 straight from HBM (no wrapper-side bf16 copy); the
    # MXU cast happens here, in VMEM, right before the matmuls.
    xi = img_ref[...].astype(jnp.bfloat16)      # (TM, k_img)
    xa = aud_ref[...].astype(jnp.bfloat16)      # (TM, k_aud)

    # Block-diagonal fused weights: wi = [W_img | 0], wa = [0 | W_aud], both
    # N = 2*n_out wide, so each matmul fills the full 256-wide v6e/v7x MXU and
    # the sum of the two f32 results is exactly [v_pre | a_pre].
    y = jnp.dot(xi, wi_ref[...], preferred_element_type=jnp.float32)
    y = y + jnp.dot(xa, wa_ref[...], preferred_element_type=jnp.float32)  # (TM, 2*n_out)

    n = y.shape[1] // 2
    v = jnp.maximum(y[:, :n], 0.0)      # F.relu(img_fe)
    a = jnp.maximum(y[:, n:], 0.0)      # F.relu(audio_fe)

    # ---- F.normalize(p=2, dim=1) + CosineSimilarity(dim=1), fused ----
    # cs = <v,a> * rsqrt(max(||v||^2, 1e-24)) * rsqrt(max(||a||^2, 1e-24)).
    # 1e-24 == (1e-12)^2 matches F.normalize's clamp on the norm; after
    # normalization the norms are 1 (or 0), so CosineSimilarity's 1e-8 clamp is
    # a no-op.  NOTE: differs from PyTorch only for rows with 0 < ||x|| < 1e-12.
    ss_v = jnp.sum(v * v, axis=1)                   # (TM,)
    ss_a = jnp.sum(a * a, axis=1)                   # (TM,)
    dot_va = jnp.sum(v * a, axis=1)                 # (TM,)
    inv = lax.rsqrt(jnp.maximum(ss_v, 1e-24)) * lax.rsqrt(jnp.maximum(ss_a, 1e-24))
    cs = dot_va * inv                               # (TM,)

    # Lane-dense (1, TM) writeback: 4 B/row of output HBM traffic (vs 512 B/row
    # for the old broadcast slab).
    out_ref[...] = cs.reshape(out_ref.shape)


def prepare_syncnet_weights(w_img, w_aud):
    """One-time weight prep, hoisted out of the per-call path.

    Pads to lane multiples, builds the block-diagonal split weights
    [W_img | 0] (k_img, 2*n_out) and [0 | W_aud] (k_aud, 2*n_out), casts to bf16.
    """
    d_img, out_dim = w_img.shape
    d_aud, out_dim_a = w_aud.shape
    assert out_dim == out_dim_a
    k_img = _round_up(d_img, _LANE)
    k_aud = _round_up(d_aud, _LANE)
    n_out = _round_up(out_dim, _LANE)

    wi = (jnp.zeros((k_img, 2 * n_out), jnp.float32)
          .at[:d_img, :out_dim].set(w_img.astype(jnp.float32))
          .astype(jnp.bfloat16))
    wa = (jnp.zeros((k_aud, 2 * n_out), jnp.float32)
          .at[:d_aud, n_out:n_out + out_dim].set(w_aud.astype(jnp.float32))
          .astype(jnp.bfloat16))

    meta = dict(d_img=d_img, d_aud=d_aud, k_img=k_img, k_aud=k_aud,
                n_out=n_out, out_dim=out_dim)
    return (wi, wa), meta


def syncnet_perception_multi(img, aud, fused_weights, meta):
    """img: (B, C, H, W), aud: (B, Ca, Ta, Fa); returns cosine similarity (B,)."""
    wi_fused, wa_fused = fused_weights
    B = img.shape[0]
    img_flat = img.reshape(B, -1)
    aud_flat = aud.reshape(B, -1)
    k_img, k_aud, n_out = meta["k_img"], meta["k_aud"], meta["n_out"]
    assert img_flat.shape[1] == meta["d_img"]
    assert aud_flat.shape[1] == meta["d_aud"]

    # Pad batch only to a multiple of 16 (sublane/bf16 packing), then pick the
    # tile from divisors of b_pad -> no whole-tile zero-row waste.
    b_pad = _round_up(B, 16)
    tm = _pick_tm(b_pad)
    num_tiles = b_pad // tm

    # Activations stay f32 into the kernel (cast to bf16 in-kernel).  Pads are
    # no-ops when the feature dims are already lane-aligned.
    img_p = _pad2(img_flat, b_pad, k_img)
    aud_p = _pad2(aud_flat, b_pad, k_aud)

    # Explicit VMEM budget: double-buffered activation tiles + resident weights.
    act_bytes = tm * (k_img + k_aud) * img_p.dtype.itemsize
    w_bytes = (wi_fused.size + wa_fused.size) * wi_fused.dtype.itemsize
    vmem_limit = int(min(64 << 20, max(24 << 20, 2 * act_bytes + w_bytes + (8 << 20))))

    cs_tiles = pl.pallas_call(
        _syncnet_kernel,
        out_shape=jax.ShapeDtypeStruct((num_tiles, tm), jnp.float32),
        grid_spec=pltpu.PrefetchScalarGridSpec(
            num_scalar_prefetch=0,
            grid=(num_tiles,),
            in_specs=[
                pl.BlockSpec((tm, k_img), lambda i: (i, 0)),
                pl.BlockSpec((tm, k_aud), lambda i: (i, 0)),
                # Weights: grid-invariant block index -> DMA'd once, VMEM-resident
                # across all batch tiles.
                # TODO(synk): real SyncNetMulti backbone (large d_in): K-tile with a
                # trailing "arbitrary" grid axis + f32 VMEM accumulator, budget the
                # tiles against v7x's 64 MiB VMEM, and mark these specs
                # pipeline_mode=pl.Buffered(1) once the weights reach multiple MiB.
                pl.BlockSpec((k_img, 2 * n_out), lambda i: (0, 0)),
                pl.BlockSpec((k_aud, 2 * n_out), lambda i: (0, 0)),
            ],
            out_specs=pl.BlockSpec((1, tm), lambda i: (i, 0)),
        ),
        compiler_params=pltpu.CompilerParams(
            # Batch tiles are independent: shard across v7x's 2 TensorCores
            # (no-op on single-TC v5e/v6e).
            dimension_semantics=("parallel",),
            vmem_limit_bytes=vmem_limit,
        ),
    )(img_p, aud_p, wi_fused, wa_fused)

    # Pad rows are exact zeros -> cs == 0 for them; slice back to the real batch.
    return cs_tiles.reshape(-1)[:B]


if __name__ == "__main__":
    key = jax.random.PRNGKey(0)
    k_img_key, k_aud_key, k_wi, k_wa = jax.random.split(key, 4)

    # Small shapes consistent with the module: 5-frame RGB mouth crops and a mel window.
    B, OUT_DIM = 2, 128
    img = jax.random.normal(k_img_key, (B, 6, 16, 16), dtype=jnp.float32)   # (B, C, H, W)
    aud = jax.random.normal(k_aud_key, (B, 1, 16, 16), dtype=jnp.float32)   # (B, Ca, Ta, Fa)

    din_img = 6 * 16 * 16
    din_aud = 1 * 16 * 16
    # Deterministic synthetic backbone weights (stand-in for the checkpoint net).
    w_img = jax.random.normal(k_wi, (din_img, OUT_DIM), dtype=jnp.float32) / jnp.sqrt(din_img)
    w_aud = jax.random.normal(k_wa, (din_aud, OUT_DIM), dtype=jnp.float32) / jnp.sqrt(din_aud)

    # Weight pad / cast / block-diag fusion done once, outside the per-call path.
    fused_weights, meta = prepare_syncnet_weights(w_img, w_aud)

    cs = syncnet_perception_multi(img, aud, fused_weights, meta)
    jax.block_until_ready(cs)

    # Pure-JAX f32 reference with the exact PyTorch math (relu / normalize / cosine).
    def ref(img, aud, w_img, w_aud):
        v = jnp.maximum(img.reshape(B, -1) @ w_img, 0.0)
        a = jnp.maximum(aud.reshape(B, -1) @ w_aud, 0.0)
        v = v / jnp.maximum(jnp.linalg.norm(v, axis=1, keepdims=True), 1e-12)
        a = a / jnp.maximum(jnp.linalg.norm(a, axis=1, keepdims=True), 1e-12)
        num = jnp.sum(v * a, axis=1)
        den = jnp.maximum(jnp.linalg.norm(v, axis=1) * jnp.linalg.norm(a, axis=1), 1e-8)
        return num / den

    expected = ref(img, aud, w_img, w_aud)
    assert cs.shape == (B,)
    # Tolerance vs the f32 reference because the kernel matmuls run in bf16
    # (f32 accumulation); the normalized cosine keeps the error tiny.
    assert jnp.allclose(cs, expected, atol=2e-2, rtol=2e-2), (cs, expected)
    print("KERNEL_OK")
</pallas_src>

<mosaic_0001>
module attributes {stable_mosaic.version = 11 : i64} {
  func.func @_syncnet_kernel(%arg0: i32, %arg1: memref<16x1536xf32, #tpu.memory_space<vmem>>, %arg2: memref<16x256xf32, #tpu.memory_space<vmem>>, %arg3: memref<1536x256xbf16, #tpu.memory_space<vmem>>, %arg4: memref<256x256xbf16, #tpu.memory_space<vmem>>, %arg5: memref<1x16xf32, #tpu.memory_space<vmem>>) attributes {dimension_semantics = [#tpu.dimension_semantics<parallel>], iteration_bounds = array<i64: 1>, scalar_prefetch = 0 : i64, scratch_operands = 0 : i64, tpu.core_type = #tpu.core_type<tc>, window_params = [{transform_indices = @transform_0, window_bounds = array<i64: 16, 1536>}, {transform_indices = @transform_1, window_bounds = array<i64: 16, 256>}, {pipeline_mode = #tpu.pipeline_mode<synchronous>, transform_indices = @transform_2, window_bounds = array<i64: 1536, 256>}, {pipeline_mode = #tpu.pipeline_mode<synchronous>, transform_indices = @transform_3, window_bounds = array<i64: 256, 256>}, {transform_indices = @transform_4, window_bounds = array<i64: 1, 16>}]} {
    %c0 = arith.constant 0 : index
    %c0_0 = arith.constant 0 : index
    %0 = vector.load %arg1[%c0, %c0_0] : memref<16x1536xf32, #tpu.memory_space<vmem>>, vector<16x1536xf32>
    %1 = arith.truncf %0 : vector<16x1536xf32> to vector<16x1536xbf16>
    %c0_1 = arith.constant 0 : index
    %c0_2 = arith.constant 0 : index
    %2 = vector.load %arg2[%c0_1, %c0_2] : memref<16x256xf32, #tpu.memory_space<vmem>>, vector<16x256xf32>
    %3 = arith.truncf %2 : vector<16x256xf32> to vector<16x256xbf16>
    %c0_3 = arith.constant 0 : index
    %c0_4 = arith.constant 0 : index
    %4 = vector.load %arg3[%c0_3, %c0_4] : memref<1536x256xbf16, #tpu.memory_space<vmem>>, vector<1536x256xbf16>
    %cst = arith.constant dense<0.000000e+00> : vector<16x256xf32>
    %5 = tpu.matmul %1, %4, %cst {dimension_numbers = #tpu.dot_dimension_numbers<[1], [0], [0], [1], [0, 0, 1, 1], [], []>} : vector<16x1536xbf16>, vector<1536x256xbf16>, vector<16x256xf32> -> vector<16x256xf32>
    %c0_5 = arith.constant 0 : index
    %c0_6 = arith.constant 0 : index
    %6 = vector.load %arg4[%c0_5, %c0_6] : memref<256x256xbf16, #tpu.memory_space<vmem>>, vector<256x256xbf16>
    %cst_7 = arith.constant dense<0.000000e+00> : vector<16x256xf32>
    %7 = tpu.matmul %3, %6, %cst_7 {dimension_numbers = #tpu.dot_dimension_numbers<[1], [0], [0], [1], [0, 0, 1, 1], [], []>} : vector<16x256xbf16>, vector<256x256xbf16>, vector<16x256xf32> -> vector<16x256xf32>
    %8 = arith.addf %5, %7 : vector<16x256xf32>
    %9 = vector.extract_strided_slice %8 {offsets = [0, 0], sizes = [16, 128], strides = [1, 1]} : vector<16x256xf32> to vector<16x128xf32>
    %cst_8 = arith.constant 0.000000e+00 : f32
    %10 = vector.broadcast %cst_8 : f32 to vector<16x128xf32>
    %11 = arith.maximumf %9, %10 : vector<16x128xf32>
    %12 = vector.extract_strided_slice %8 {offsets = [0, 128], sizes = [16, 128], strides = [1, 1]} : vector<16x256xf32> to vector<16x128xf32>
    %cst_9 = arith.constant 0.000000e+00 : f32
    %13 = vector.broadcast %cst_9 : f32 to vector<16x128xf32>
    %14 = arith.maximumf %12, %13 : vector<16x128xf32>
    %15 = arith.mulf %11, %11 : vector<16x128xf32>
    %cst_10 = arith.constant dense<0.000000e+00> : vector<16xf32>
    %16 = vector.multi_reduction <add>, %15, %cst_10 [1] : vector<16x128xf32> to vector<16xf32>
    %17 = arith.mulf %14, %14 : vector<16x128xf32>
    %cst_11 = arith.constant dense<0.000000e+00> : vector<16xf32>
    %18 = vector.multi_reduction <add>, %17, %cst_11 [1] : vector<16x128xf32> to vector<16xf32>
    %19 = arith.mulf %11, %14 : vector<16x128xf32>
    %cst_12 = arith.constant dense<0.000000e+00> : vector<16xf32>
    %20 = vector.multi_reduction <add>, %19, %cst_12 [1] : vector<16x128xf32> to vector<16xf32>
    %cst_13 = arith.constant 1.000000e-24 : f32
    %21 = vector.broadcast %cst_13 : f32 to vector<16xf32>
    %22 = arith.maximumf %16, %21 : vector<16xf32>
    %23 = math.rsqrt %22 : vector<16xf32>
    %cst_14 = arith.constant 1.000000e-24 : f32
    %24 = vector.broadcast %cst_14 : f32 to vector<16xf32>
    %25 = arith.maximumf %18, %24 : vector<16xf32>
    %26 = math.rsqrt %25 : vector<16xf32>
    %27 = arith.mulf %23, %26 : vector<16xf32>
    %28 = arith.mulf %20, %27 : vector<16xf32>
    %29 = vector.shape_cast %28 : vector<16xf32> to vector<1x16xf32>
    %c0_15 = arith.constant 0 : index
    %c0_16 = arith.constant 0 : index
    %30 = vector.load %arg5[%c0_15, %c0_16] : memref<1x16xf32, #tpu.memory_space<vmem>>, vector<1x16xf32>
    tpu.vector_store %arg5[%c0_15, %c0_16], %29 {strides = array<i32>} : memref<1x16xf32, #tpu.memory_space<vmem>>, vector<1x16xf32>,
    return
  }
  func.func @transform_0(%arg0: i32) -> (i32, i32) {
    %c0_i32 = arith.constant 0 : i32
    %c0_i32_0 = arith.constant 0 : i32
    return %arg0, %c0_i32 : i32, i32
  }
  func.func @transform_1(%arg0: i32) -> (i32, i32) {
    %c0_i32 = arith.constant 0 : i32
    %c0_i32_0 = arith.constant 0 : i32
    return %arg0, %c0_i32 : i32, i32
  }
  func.func @transform_2(%arg0: i32) -> (i32, i32) {
    %c0_i32 = arith.constant 0 : i32
    %c0_i32_0 = arith.constant 0 : i32
    %c0_i32_1 = arith.constant 0 : i32
    return %c0_i32, %c0_i32_0 : i32, i32
  }
  func.func @transform_3(%arg0: i32) -> (i32, i32) {
    %c0_i32 = arith.constant 0 : i32
    %c0_i32_0 = arith.constant 0 : i32
    %c0_i32_1 = arith.constant 0 : i32
    return %c0_i32, %c0_i32_0 : i32, i32
  }
  func.func @transform_4(%arg0: i32) -> (i32, i32) {
    %c0_i32 = arith.constant 0 : i32
    %c0_i32_0 = arith.constant 0 : i32
    return %arg0, %c0_i32 : i32, i32
  }
}

</mosaic_0001>

<bundles_post_ra>
// kernel: tpu_custom_call.1
= control target key start
LH: loop header
LB: loop body
LE: loop exit
PB: predicated region body
PF: predicated region fallthrough
CT: control target
= control target key end

     0   :  { %9 = vsyncpa [#allocation3], 0  ;;  %s2646_s0 = inlined_call_operand.hbm [shape: f32[16,1536], index: 0, kind: input, shape index: {}]   ;;  %s2647_s1 = inlined_call_operand.hbm [shape: f32[16,256], index: 1, kind: input, shape index: {}]   ;;  %s2648_s2 = inlined_call_operand.hbm [shape: bf16[1536,256], index: 2, kind: input, shape index: {}]   ;;  %s2649_s3 = inlined_call_operand.hbm [shape: bf16[256,256], index: 3, kind: input, shape index: {}]   ;;  %s2650_s4 = inlined_call_operand.hbm [shape: f32[1,16], index: 4, kind: output, shape index: {}]  }
   0x1   :  { %10 = vsyncpa [#allocation6], 0 }
   0x2   :  { %11 = vsyncpa [#allocation9], 0 }
   0x3   :  { %12 = vsyncpa [#allocation4], 0  ;;  %s2550_s15 = smov [#allocation5]   ;;  %s2432_s19 = scalar_lea.hbm %s2647_s1, 512 }
   0x4   :  { %s30_s16 = sshll.u32 %s2550_s15, 4  ;;  %p2433_p0 = scmp.ne.s32.totalorder %s2647_s1, %s2432_s19  ;;  %s31_s16 = int_to_ptr.vmem [resolvable:$true] %s30_s16 }
   0x5   :  { %p2436_p1 = scmp.lt.u32.totalorder %s2432_s19, %s2647_s1 }
   0x7   :  { %p2438_p2 = pnand %p2436_p1, %p2433_p0 }
   0x9   :  { %2441 = shalt.err (!%p2438_p2)
}
   0xa   :  { %s2442_s24 = scalar_lea.vmem %s31_s16, 512  ;;  %p2447_p4 = scmp.lt.s32.totalorder %s31_s16, %s31_s16 }
   0xb   :  { %p2443_p3 = scmp.ne.s32.totalorder %s31_s16, %s2442_s24  ;;  %p2448_p5 = scmp.lt.s32.totalorder %s2442_s24, %s2442_s24 }
   0xd   :  { %p2449_p6 = por %p2448_p5, %p2447_p4 }
   0xf   :  { %p2450_p7 = pnand %p2449_p6, %p2443_p3 }
  0x11   :  { %2453 = shalt.err (!%p2450_p7)
}
  0x12   :  { %s2551_s25 = smov 256   ;;  %s2552_s26 = smov 16  }
  0x13   :  { %36 = dma.hbm_to_vmem [thread:$0]  %s2647_s1, 512, %s31_s16, [#allocation6], %s2551_s25, %s2551_s25, %s2552_s26  }
  0x14   :  { %s2553_s29 = smov [#allocation2]   ;;  %s2454_s7 = scalar_lea.hbm %s2646_s0, 3072 }
  0x15   :  { %s18_s30 = sshll.u32 %s2553_s29, 4  ;;  %p2455_p8 = scmp.ne.s32.totalorder %s2646_s0, %s2454_s7  ;;  %s19_s30 = int_to_ptr.vmem [resolvable:$true] %s18_s30 }
  0x16   :  { %p2458_p9 = scmp.lt.u32.totalorder %s2454_s7, %s2646_s0 }
  0x18   :  { %p2460_p10 = pnand %p2458_p9, %p2455_p8 }
  0x1a   :  { %2463 = shalt.err (!%p2460_p10)
}
  0x1b   :  { %s2464_s12 = scalar_lea.vmem %s19_s30, 3072  ;;  %p2469_p12 = scmp.lt.s32.totalorder %s19_s30, %s19_s30 }
  0x1c   :  { %p2465_p11 = scmp.ne.s32.totalorder %s19_s30, %s2464_s12  ;;  %p2470_p13 = scmp.lt.s32.totalorder %s2464_s12, %s2464_s12 }
  0x1e   :  { %p2471_p0 = por %p2470_p13, %p2469_p12 }
  0x20   :  { %p2472_p1 = pnand %p2471_p0, %p2465_p11 }
  0x22   :  { %2475 = shalt.err (!%p2472_p1)
}
  0x23   :  { %s2554_s1 = smov 1536   ;;  %s2555_s13 = smov 96  }
  0x24   :  { %24 = dma.hbm_to_vmem [thread:$0]  %s2646_s0, 3072, %s19_s30, [#allocation3], %s2554_s1, %s2554_s1, %s2555_s13  }
  0x25   :  { %s2556_s16 = smov [#allocation7]   ;;  %s2476_s20 = scalar_lea.hbm %s2648_s2, 24576 }
  0x26   :  { %s42_s17 = sshll.u32 %s2556_s16, 4  ;;  %p2477_p2 = scmp.ne.s32.totalorder %s2648_s2, %s2476_s20  ;;  %s43_s17 = int_to_ptr.vmem [resolvable:$true] %s42_s17 }
  0x27   :  { %p2480_p3 = scmp.lt.u32.totalorder %s2476_s20, %s2648_s2 }
  0x29   :  { %p2482_p4 = pnand %p2480_p3, %p2477_p2 }
  0x2b   :  { %2485 = shalt.err (!%p2482_p4)
}
  0x2c   :  { %s2486_s25 = scalar_lea.vmem %s43_s17, 24576  ;;  %p2491_p6 = scmp.lt.s32.totalorder %s43_s17, %s43_s17 }
  0x2d   :  { %p2487_p5 = scmp.ne.s32.totalorder %s43_s17, %s2486_s25  ;;  %p2492_p7 = scmp.lt.s32.totalorder %s2486_s25, %s2486_s25 }
  0x2f   :  { %p2493_p8 = por %p2492_p7, %p2491_p6 }
  0x31   :  { %p2494_p9 = pnand %p2493_p8, %p2487_p5 }
  0x33   :  { %2497 = shalt.err (!%p2494_p9)
}
  0x34   :  { %s2557_s0 = smov 128   ;;  %s2558_s26 = smov 8  }
  0x35   :  { %48 = dma.hbm_to_vmem [thread:$0]  %s2648_s2, 24576, %s43_s17, [#allocation6], %s2557_s0, %s2557_s0, %s2558_s26  }
  0x36   :  { %s2559_s29 = smov [#allocation8]   ;;  %s2498_s7 = scalar_lea.hbm %s2649_s3, 4096 }
  0x37   :  { %s54_s30 = sshll.u32 %s2559_s29, 4  ;;  %p2499_p10 = scmp.ne.s32.totalorder %s2649_s3, %s2498_s7  ;;  %s55_s30 = int_to_ptr.vmem [resolvable:$true] %s54_s30 }
  0x38   :  { %p2502_p11 = scmp.lt.u32.totalorder %s2498_s7, %s2649_s3 }
  0x3a   :  { %p2504_p12 = pnand %p2502_p11, %p2499_p10 }
  0x3c   :  { %2507 = shalt.err (!%p2504_p12)
}
  0x3d   :  { %s2508_s12 = scalar_lea.vmem %s55_s30, 4096  ;;  %p2513_p0 = scmp.lt.s32.totalorder %s55_s30, %s55_s30 }
  0x3e   :  { %p2509_p13 = scmp.ne.s32.totalorder %s55_s30, %s2508_s12  ;;  %p2514_p1 = scmp.lt.s32.totalorder %s2508_s12, %s2508_s12 }
  0x40   :  { %p2515_p2 = por %p2514_p1, %p2513_p0 }
  0x42   :  { %p2516_p3 = pnand %p2515_p2, %p2509_p13 }
  0x44   :  { %2519 = shalt.err (!%p2516_p3)
}
  0x45   :  { %60 = dma.hbm_to_vmem [thread:$0]  %s2649_s3, 4096, %s55_s30, [#allocation9], %s2557_s0, %s2557_s0, %s2558_s26  }
  0x46   :  { %2542 = dma.done.wait [#allocation3], 3072  }
  0x47   :  { %2543 = vsyncadd [#allocation3], 4294964224 }
  0x48   :  { %2544 = dma.done.wait [#allocation6], 25088  }
  0x49   :  { %2545 = vsyncadd [#allocation6], 4294942208 }
  0x4a   :  { %2546 = dma.done.wait [#allocation9], 4096  }
  0x4b   :  { %2547 = vsyncadd [#allocation9], 4294963200  ;;  %v2088_v0 = vld [vmem:[#allocation8 + $0x4] ss:$8 sps:$4 sm:$0xff]   ;;  %v2092_v2 = vld [vmem:[#allocation8] ss:$8 sps:$4 sm:$0xff]  }
  0x4c   :  { %v2090_v1 = vld [vmem:[#allocation7 + $0x204] ss:$8 sps:$4 sm:$0xff]   ;;  %499 = vmatprep.subr.bf16.mxu1 %v2088_v0  ;;  %v2093_v3 = vld [vmem:[#allocation7 + $0x200] ss:$8 sps:$4 sm:$0xff]   ;;  %v2094_v4 = vld [vmem:[#allocation8 + $0x14] ss:$8 sps:$4 sm:$0xff]  }
  0x4d   :  { %1588 = vmatprep.subr.bf16.mxu0 %v2090_v1  ;;  %500 = vmatpush1.bf16.msra.mxu1 %v2092_v2  ;;  %v2096_v5 = vld [vmem:[#allocation7 + $0x214] ss:$8 sps:$4 sm:$0xff]   ;;  %v2098_v6 = vld [vmem:[#allocation8 + $0x10] ss:$8 sps:$4 sm:$0xff]   ;;  %v2100_v8 = vld [vmem:[#allocation8 + $0x24] ss:$8 sps:$4 sm:$0xff]  }
  0x4e   :  { %1589 = vmatpush1.bf16.msra.mxu0 %v2093_v3  ;;  %501 = vmatprep.subr.bf16.mxu1 %v2094_v4  ;;  %v2099_v7 = vld [vmem:[#allocation7 + $0x210] ss:$8 sps:$4 sm:$0xff]   ;;  %v2102_v9 = vld [vmem:[#allocation7 + $0x224] ss:$8 sps:$4 sm:$0xff]   ;;  %v2104_v10 = vld [vmem:[#allocation8 + $0x20] ss:$8 sps:$4 sm:$0xff]  }
  0x4f   :  { %1590 = vmatprep.subr.bf16.mxu0 %v2096_v5  ;;  %v2105_v11 = vld [vmem:[#allocation7 + $0x220] ss:$8 sps:$4 sm:$0xff]   ;;  %v2106_v12 = vld [vmem:[#allocation8 + $0x34] ss:$8 sps:$4 sm:$0xff]   ;;  %v2110_v14 = vld [vmem:[#allocation8 + $0x30] ss:$8 sps:$4 sm:$0xff]  }
  0x50   :  { %v2108_v13 = vld [vmem:[#allocation7 + $0x234] ss:$8 sps:$4 sm:$0xff]   ;;  %v2111_v15 = vld [vmem:[#allocation7 + $0x230] ss:$8 sps:$4 sm:$0xff]   ;;  %v2112_v16 = vld [vmem:[#allocation8 + $0x44] ss:$8 sps:$4 sm:$0xff]  }
  0x51   :  { %502 = vmatpush1.bf16.msra.mxu1 %v2098_v6  ;;  %v2114_v17 = vld [vmem:[#allocation7 + $0x244] ss:$8 sps:$4 sm:$0xff]   ;;  %v2116_v18 = vld [vmem:[#allocation8 + $0x40] ss:$8 sps:$4 sm:$0xff]   ;;  %v2118_v20 = vld [vmem:[#allocation8 + $0x54] ss:$8 sps:$4 sm:$0xff]  }
  0x52   :  { %1591 = vmatpush1.bf16.msra.mxu0 %v2099_v7  ;;  %503 = vmatprep.subr.bf16.mxu1 %v2100_v8  ;;  %v2117_v19 = vld [vmem:[#allocation7 + $0x240] ss:$8 sps:$4 sm:$0xff]   ;;  %v2120_v21 = vld [vmem:[#allocation7 + $0x254] ss:$8 sps:$4 sm:$0xff]   ;;  %v2122_v22 = vld [vmem:[#allocation8 + $0x50] ss:$8 sps:$4 sm:$0xff]  }
  0x53   :  { %1592 = vmatprep.subr.bf16.mxu0 %v2102_v9  ;;  %v2123_v23 = vld [vmem:[#allocation7 + $0x250] ss:$8 sps:$4 sm:$0xff]   ;;  %v2124_v24 = vld [vmem:[#allocation8 + $0x64] ss:$8 sps:$4 sm:$0xff]   ;;  %v2128_v26 = vld [vmem:[#allocation8 + $0x60] ss:$8 sps:$4 sm:$0xff]  }
  0x54   :  { %v2126_v25 = vld [vmem:[#allocation7 + $0x264] ss:$8 sps:$4 sm:$0xff]   ;;  %v2129_v27 = vld [vmem:[#allocation7 + $0x260] ss:$8 sps:$4 sm:$0xff]   ;;  %v2130_v28 = vld [vmem:[#allocation8 + $0x74] ss:$8 sps:$4 sm:$0xff]  }
  0x55   :  { %504 = vmatpush1.bf16.msra.mxu1 %v2104_v10  ;;  %v2132_v29 = vld [vmem:[#allocation7 + $0x274] ss:$8 sps:$4 sm:$0xff]   ;;  %v2134_v30 = vld [vmem:[#allocation8 + $0x70] ss:$8 sps:$4 sm:$0xff]   ;;  %v2136_v32 = vld [vmem:[#allocation8 + $0x84] ss:$8 sps:$4 sm:$0xff]  }
  0x56   :  { %1593 = vmatpush1.bf16.msra.mxu0 %v2105_v11  ;;  %505 = vmatprep.subr.bf16.mxu1 %v2106_v12  ;;  %v2135_v31 = vld [vmem:[#allocation7 + $0x270] ss:$8 sps:$4 sm:$0xff]   ;;  %v2138_v33 = vld [vmem:[#allocation7 + $0x284] ss:$8 sps:$4 sm:$0xff]   ;;  %v2140_v34 = vld [vmem:[#allocation8 + $0x80] ss:$8 sps:$4 sm:$0xff]  }
  0x57   :  { %1594 = vmatprep.subr.bf16.mxu0 %v2108_v13  ;;  %v2141_v35 = vld [vmem:[#allocation7 + $0x280] ss:$8 sps:$4 sm:$0xff]   ;;  %v2142_v36 = vld [vmem:[#allocation8 + $0x94] ss:$8 sps:$4 sm:$0xff]   ;;  %v2146_v38 = vld [vmem:[#allocation8 + $0x90] ss:$8 sps:$4 sm:$0xff]  }
  0x58   :  { %v2144_v37 = vld [vmem:[#allocation7 + $0x294] ss:$8 sps:$4 sm:$0xff]   ;;  %v2147_v39 = vld [vmem:[#allocation7 + $0x290] ss:$8 sps:$4 sm:$0xff]   ;;  %v2148_v40 = vld [vmem:[#allocation8 + $0xa4] ss:$8 sps:$4 sm:$0xff]  }
  0x59   :  { %506 = vmatpush1.bf16.msra.mxu1 %v2110_v14  ;;  %v2150_v41 = vld [vmem:[#allocation7 + $0x2a4] ss:$8 sps:$4 sm:$0xff]   ;;  %v2152_v42 = vld [vmem:[#allocation8 + $0xa0] ss:$8 sps:$4 sm:$0xff]   ;;  %v2154_v44 = vld [vmem:[#allocation8 + $0xb4] ss:$8 sps:$4 sm:$0xff]  }
  0x5a   :  { %1595 = vmatpush1.bf16.msra.mxu0 %v2111_v15  ;;  %507 = vmatprep.subr.bf16.mxu1 %v2112_v16  ;;  %v2153_v43 = vld [vmem:[#allocation7 + $0x2a0] ss:$8 sps:$4 sm:$0xff]   ;;  %v2156_v45 = vld [vmem:[#allocation7 + $0x2b4] ss:$8 sps:$4 sm:$0xff]   ;;  %v2158_v46 = vld [vmem:[#allocation8 + $0xb0] ss:$8 sps:$4 sm:$0xff]  }
  0x5b   :  { %1596 = vmatprep.subr.bf16.mxu0 %v2114_v17  ;;  %v2159_v47 = vld [vmem:[#allocation7 + $0x2b0] ss:$8 sps:$4 sm:$0xff]   ;;  %v110_v48 = vld [vmem:[#allocation5 + $0x8] sm:$0xff]  ;;  %v2166_v58 = vld [vmem:[#allocation8 + $0xd4] ss:$8 sps:$4 sm:$0xff]   ;;  %s2560_s3 = smov [#allocation10]  }
  0x5c   :  { %v112_v49 = vld [vmem:[#allocation5 + $0x18] sm:$0xff]  ;;  %v2160_v50 = vld [vmem:[#allocation8 + $0xc4] ss:$8 sps:$4 sm:$0xff]   ;;  %v2164_v56 = vld [vmem:[#allocation8 + $0xc0] ss:$8 sps:$4 sm:$0xff]   ;;  %s1818_s13 = sshll.u32 %s2560_s3, 4  ;;  %s1819_s13 = int_to_ptr.vmem [resolvable:$true] %s1818_s13 }
  0x5d   :  { %508 = vmatpush1.bf16.msra.mxu1 %v2116_v18  ;;  %v2162_v51 = vld [vmem:[#allocation7 + $0x2c4] ss:$8 sps:$4 sm:$0xff]   ;;  %v114_v52 = vpack.c.bf16 %v112_v49, %v110_v48  ;;  %v2165_v57 = vld [vmem:[#allocation7 + $0x2c0] ss:$8 sps:$4 sm:$0xff]   ;;  %v2168_v59 = vld [vmem:[#allocation7 + $0x2d4] ss:$8 sps:$4 sm:$0xff]   ;;  %p2525_p5 = scmp.lt.s32.totalorder %s1819_s13, %s1819_s13 }
  0x5e   :  { %1597 = vmatpush1.bf16.msra.mxu0 %v2117_v19  ;;  %509 = vmatprep.subr.bf16.mxu1 %v2118_v20  ;;  %v78_v53 = vld [vmem:[#allocation2 + $0x28] sm:$0xff]  ;;  %v2170_v60 = vld [vmem:[#allocation8 + $0xd0] ss:$8 sps:$4 sm:$0xff]   ;;  %v2178_v2 = vld [vmem:[#allocation8 + $0xf4] ss:$8 sps:$4 sm:$0xff]   ;;  %vm1807_vm0 = vcmask 130112  }
  0x5f   :  { %1598 = vmatprep.subr.bf16.mxu0 %v2120_v21  ;;  %v90_v54 = vld [vmem:[#allocation2 + $0x88] sm:$0xff]  ;;  %531 = vmatprep.mubr.bf16.mxu1 %v114_v52  ;;  %v2171_v61 = vld [vmem:[#allocation7 + $0x2d0] ss:$8 sps:$4 sm:$0xff]   ;;  %v2180_v3 = vld [vmem:[#allocation7 + $0x2f4] ss:$8 sps:$4 sm:$0xff]   ;;  %vm1810_vm1 = vcmask 122880  }
  0x60   :  { %v102_v55 = vpack.c.bf16 %v90_v54, %v78_v53  ;;  %v2172_v62 = vld [vmem:[#allocation8 + $0xe4] ss:$8 sps:$4 sm:$0xff]   ;;  %v2176_v0 = vld [vmem:[#allocation8 + $0xe0] ss:$8 sps:$4 sm:$0xff]   ;;  %v2182_v4 = vld [vmem:[#allocation8 + $0xf0] ss:$8 sps:$4 sm:$0xff]  }
  0x61   :  { %510 = vmatpush1.bf16.msra.mxu1 %v2122_v22  ;;  %v2174_v63 = vld [vmem:[#allocation7 + $0x2e4] ss:$8 sps:$4 sm:$0xff]   ;;  %v2177_v1 = vld [vmem:[#allocation7 + $0x2e0] ss:$8 sps:$4 sm:$0xff]   ;;  %v2183_v5 = vld [vmem:[#allocation7 + $0x2f0] ss:$8 sps:$4 sm:$0xff]  }
  0x62   :  { %1599 = vmatpush1.bf16.msra.mxu0 %v2123_v23  ;;  %511 = vmatprep.subr.bf16.mxu1 %v2124_v24  ;;  %v109_v6 = vld [vmem:[#allocation5] sm:$0xff]  ;;  %v111_v8 = vld [vmem:[#allocation5 + $0x10] sm:$0xff]  ;;  %s2520_s14 = scalar_lea.vmem %s1819_s13, 16  ;;  %s2524_s15 = scalar_lea.vmem %s1819_s13, 32 }
  0x63   :  { %1600 = vmatprep.subr.bf16.mxu0 %v2126_v25  ;;  %1620 = vmatprep.mubr.bf16.mxu0 %v102_v55  ;;  %v2186_v7 = vld [vmem:[#allocation7 + $0x4] ss:$8 sps:$4 sm:$0xff]   ;;  %v2184_v12 = vld [vmem:[#allocation7] ss:$8 sps:$4 sm:$0xff]   ;;  %v113_v14 = vpack.c.bf16 %v111_v8, %v109_v6  ;;  %v2192_v16 = vld [vmem:[#allocation7 + $0x14] ss:$8 sps:$4 sm:$0xff]   ;;  %p2521_p4 = scmp.ne.s32.totalorder %s1819_s13, %s2520_s14  ;;  %p2526_p6 = scmp.lt.s32.totalorder %s2524_s15, %s2520_s14 }
  0x64   :  { %v77_v9 = vld [vmem:[#allocation2 + $0x20] sm:$0xff]  ;;  %v2195_v17 = vld [vmem:[#allocation7 + $0x314] ss:$8 sps:$4 sm:$0xff]   ;;  %v2190_v18 = vld [vmem:[#allocation7 + $0x10] ss:$8 sps:$4 sm:$0xff]  }
  0x65   :  { %512 = vmatpush1.bf16.msra.mxu1 %v2128_v26  ;;  %v89_v10 = vld [vmem:[#allocation2 + $0x80] sm:$0xff]  ;;  %v2193_v19 = vld [vmem:[#allocation7 + $0x310] ss:$8 sps:$4 sm:$0xff]   ;;  %v2204_v24 = vld [vmem:[#allocation7 + $0x34] ss:$8 sps:$4 sm:$0xff]   ;;  %p2527_p7 = por %p2526_p6, %p2525_p5 }
  0x66   :  { %1601 = vmatpush1.bf16.msra.mxu0 %v2129_v27  ;;  %513 = vmatprep.subr.bf16.mxu1 %v2130_v28  ;;  %v2189_v11 = vld [vmem:[#allocation7 + $0x304] ss:$8 sps:$4 sm:$0xff]   ;;  %v2187_v13 = vld [vmem:[#allocation7 + $0x300] ss:$8 sps:$4 sm:$0xff]   ;;  %v101_v15 = vpack.c.bf16 %v89_v10, %v77_v9  ;;  %v2207_v25 = vld [vmem:[#allocation7 + $0x334] ss:$8 sps:$4 sm:$0xff]  }
  0x67   :  { %1602 = vmatprep.subr.bf16.mxu0 %v2132_v29  ;;  %v2198_v20 = vld [vmem:[#allocation7 + $0x24] ss:$8 sps:$4 sm:$0xff]   ;;  %v2196_v22 = vld [vmem:[#allocation7 + $0x20] ss:$8 sps:$4 sm:$0xff]   ;;  %v2202_v26 = vld [vmem:[#allocation7 + $0x30] ss:$8 sps:$4 sm:$0xff]   ;;  %p2528_p8 = pnand %p2527_p7, %p2521_p4 }
  0x68   :  { %v2201_v21 = vld [vmem:[#allocation7 + $0x324] ss:$8 sps:$4 sm:$0xff]   ;;  %v2199_v23 = vld [vmem:[#allocation7 + $0x320] ss:$8 sps:$4 sm:$0xff]   ;;  %v2205_v27 = vld [vmem:[#allocation7 + $0x330] ss:$8 sps:$4 sm:$0xff]  }
  0x69   :  { %514 = vmatpush1.bf16.msra.mxu1 %v2134_v30  ;;  %v2210_v28 = vld [vmem:[#allocation7 + $0x44] ss:$8 sps:$4 sm:$0xff]   ;;  %v2208_v30 = vld [vmem:[#allocation7 + $0x40] ss:$8 sps:$4 sm:$0xff]   ;;  %v2226_v48 = vld [vmem:[#allocation7 + $0x70] ss:$8 sps:$4 sm:$0xff]  }
  0x6a   :  { %1603 = vmatpush1.bf16.msra.mxu0 %v2135_v31  ;;  %515 = vmatprep.subr.bf16.mxu1 %v2136_v32  ;;  %v2213_v29 = vld [vmem:[#allocation7 + $0x344] ss:$8 sps:$4 sm:$0xff]   ;;  %v2211_v31 = vld [vmem:[#allocation7 + $0x340] ss:$8 sps:$4 sm:$0xff]   ;;  %v2216_v32 = vld [vmem:[#allocation7 + $0x54] ss:$8 sps:$4 sm:$0xff]  }
  0x6b   :  { %1604 = vmatprep.subr.bf16.mxu0 %v2138_v33  ;;  %v2219_v33 = vld [vmem:[#allocation7 + $0x354] ss:$8 sps:$4 sm:$0xff]   ;;  %v2229_v49 = vld [vmem:[#allocation7 + $0x370] ss:$8 sps:$4 sm:$0xff]   ;;  %v2232_v52 = vld [vmem:[#allocation7 + $0x80] ss:$8 sps:$4 sm:$0xff]  }
  0x6c   :  { %v2235_v53 = vld [vmem:[#allocation7 + $0x380] ss:$8 sps:$4 sm:$0xff]   ;;  %v2240_v54 = vld [vmem:[#allocation7 + $0x94] ss:$8 sps:$4 sm:$0xff]   ;;  %v2262_v8 = vld [vmem:[#allocation7 + $0xd0] ss:$8 sps:$4 sm:$0xff]  }
  0x6d   :  { %516 = vmatpush1.bf16.msra.mxu1 %v2140_v34  ;;  %v2214_v34 = vld [vmem:[#allocation7 + $0x50] ss:$8 sps:$4 sm:$0xff]   ;;  %v2243_v55 = vld [vmem:[#allocation7 + $0x394] ss:$8 sps:$4 sm:$0xff]   ;;  %v2270_v10 = vld [vmem:[#allocation7 + $0xe4] ss:$8 sps:$4 sm:$0xff]  }
  0x6e   :  { %1605 = vmatpush1.bf16.msra.mxu0 %v2141_v35  ;;  %517 = vmatprep.subr.bf16.mxu1 %v2142_v36  ;;  %v2217_v35 = vld [vmem:[#allocation7 + $0x350] ss:$8 sps:$4 sm:$0xff]   ;;  %v2222_v36 = vld [vmem:[#allocation7 + $0x64] ss:$8 sps:$4 sm:$0xff]   ;;  %v2264_v6 = vld [vmem:[#allocation7 + $0xd4] ss:$8 sps:$4 sm:$0xff]  }
  0x6f   :  { %1606 = vmatprep.subr.bf16.mxu0 %v2144_v37  ;;  %v2225_v37 = vld [vmem:[#allocation7 + $0x364] ss:$8 sps:$4 sm:$0xff]   ;;  %v2265_v9 = vld [vmem:[#allocation7 + $0x3d0] ss:$8 sps:$4 sm:$0xff]  }
  0x71   :  { %518 = vmatpush1.bf16.msra.mxu1 %v2146_v38  ;;  %v2220_v38 = vld [vmem:[#allocation7 + $0x60] ss:$8 sps:$4 sm:$0xff]  }
  0x72   :  { %1607 = vmatpush1.bf16.msra.mxu0 %v2147_v39  ;;  %519 = vmatprep.subr.bf16.mxu1 %v2148_v40  ;;  %v2223_v39 = vld [vmem:[#allocation7 + $0x360] ss:$8 sps:$4 sm:$0xff]  }
  0x73   :  { %1608 = vmatprep.subr.bf16.mxu0 %v2150_v41  ;;  %v74_v40 = vld [vmem:[#allocation2 + $0x8] sm:$0xff] }
  0x74   :  { %v86_v41 = vld [vmem:[#allocation2 + $0x68] sm:$0xff] }
  0x75   :  { %520 = vmatpush1.bf16.msra.mxu1 %v2152_v42  ;;  %v2228_v42 = vld [vmem:[#allocation7 + $0x74] ss:$8 sps:$4 sm:$0xff]  }
  0x76   :  { %1609 = vmatpush1.bf16.msra.mxu0 %v2153_v43  ;;  %521 = vmatprep.subr.bf16.mxu1 %v2154_v44  ;;  %v2231_v43 = vld [vmem:[#allocation7 + $0x374] ss:$8 sps:$4 sm:$0xff]   ;;  %v98_v44 = vpack.c.bf16 %v86_v41, %v74_v40  ;;  %v2295_v40 = vld [vmem:[#allocation7 + $0x420] ss:$8 sps:$4 sm:$0xff]  }
  0x77   :  { %1610 = vmatprep.subr.bf16.mxu0 %v2156_v45  ;;  %v80_v45 = vld [vmem:[#allocation2 + $0x38] sm:$0xff] }
  0x78   :  { %v2300_v41 = vld [vmem:[#allocation7 + $0x134] ss:$8 sps:$4 sm:$0xff]  }
  0x79   :  { %522 = vmatpush1.bf16.msra.mxu1 %v2158_v46  ;;  %v92_v46 = vld [vmem:[#allocation2 + $0x98] sm:$0xff] }
  0x7a   :  { %1611 = vmatpush1.bf16.msra.mxu0 %v2159_v47  ;;  %523 = vmatprep.subr.bf16.mxu1 %v2160_v50  ;;  %v104_v47 = vpack.c.bf16 %v92_v46, %v80_v45  ;;  %v2234_v50 = vld [vmem:[#allocation7 + $0x84] ss:$8 sps:$4 sm:$0xff]   ;;  %v2301_v45 = vld [vmem:[#allocation7 + $0x430] ss:$8 sps:$4 sm:$0xff]  }
  0x7b   :  { %1612 = vmatprep.subr.bf16.mxu0 %v2162_v51  ;;  %v2237_v51 = vld [vmem:[#allocation7 + $0x384] ss:$8 sps:$4 sm:$0xff]  }
  0x7c   :  { %v2306_v46 = vld [vmem:[#allocation7 + $0x144] ss:$8 sps:$4 sm:$0xff]  }
  0x7d   :  { %524 = vmatpush1.bf16.msra.mxu1 %v2164_v56  ;;  %v2238_v56 = vld [vmem:[#allocation7 + $0x90] ss:$8 sps:$4 sm:$0xff]  }
  0x7e   :  { %1613 = vmatpush1.bf16.msra.mxu0 %v2165_v57  ;;  %525 = vmatprep.subr.bf16.mxu1 %v2166_v58  ;;  %v2241_v57 = vld [vmem:[#allocation7 + $0x390] ss:$8 sps:$4 sm:$0xff]   ;;  %v2246_v58 = vld [vmem:[#allocation7 + $0xa4] ss:$8 sps:$4 sm:$0xff]  }
  0x7f   :  { %1614 = vmatprep.subr.bf16.mxu0 %v2168_v59  ;;  %v2249_v59 = vld [vmem:[#allocation7 + $0x3a4] ss:$8 sps:$4 sm:$0xff]  }
  0x81   :  { %526 = vmatpush1.bf16.msra.mxu1 %v2170_v60  ;;  %v2244_v60 = vld [vmem:[#allocation7 + $0xa0] ss:$8 sps:$4 sm:$0xff]  }
  0x82   :  { %1615 = vmatpush1.bf16.msra.mxu0 %v2171_v61  ;;  %527 = vmatprep.subr.bf16.mxu1 %v2172_v62  ;;  %v2247_v61 = vld [vmem:[#allocation7 + $0x3a0] ss:$8 sps:$4 sm:$0xff]   ;;  %v2252_v62 = vld [vmem:[#allocation7 + $0xb4] ss:$8 sps:$4 sm:$0xff]  }
  0x83   :  { %1616 = vmatprep.subr.bf16.mxu0 %v2174_v63  ;;  %v2255_v63 = vld [vmem:[#allocation7 + $0x3b4] ss:$8 sps:$4 sm:$0xff]  }
  0x85   :  { %528 = vmatpush1.bf16.msra.mxu1 %v2176_v0  ;;  %v2250_v0 = vld [vmem:[#allocation7 + $0xb0] ss:$8 sps:$4 sm:$0xff]  }
  0x86   :  { %1617 = vmatpush1.bf16.msra.mxu0 %v2177_v1  ;;  %529 = vmatprep.subr.bf16.mxu1 %v2178_v2  ;;  %v2253_v1 = vld [vmem:[#allocation7 + $0x3b0] ss:$8 sps:$4 sm:$0xff]   ;;  %v2258_v2 = vld [vmem:[#allocation7 + $0xc4] ss:$8 sps:$4 sm:$0xff]  }
  0x87   :  { %1618 = vmatprep.subr.bf16.mxu0 %v2180_v3  ;;  %v2261_v3 = vld [vmem:[#allocation7 + $0x3c4] ss:$8 sps:$4 sm:$0xff]  }
  0x89   :  { %530 = vmatpush1.bf16.msra.mxu1 %v2182_v4  ;;  %v2256_v4 = vld [vmem:[#allocation7 + $0xc0] ss:$8 sps:$4 sm:$0xff]  }
  0x8a   :  { %1619 = vmatpush1.bf16.msra.mxu0 %v2183_v5  ;;  %1502 = vmatprep.subr.bf16.mxu1 %v2186_v7  ;;  %v2259_v5 = vld [vmem:[#allocation7 + $0x3c0] ss:$8 sps:$4 sm:$0xff]   ;;  %v2267_v7 = vld [vmem:[#allocation7 + $0x3d4] ss:$8 sps:$4 sm:$0xff]  }
  0x8b   :  { %1631 = vmatprep.subr.bf16.mxu0 %v2189_v11  ;;  %v2273_v11 = vld [vmem:[#allocation7 + $0x3e4] ss:$8 sps:$4 sm:$0xff]  }
  0x8c   :  { %532 = vmatmul.mubr.bf16.vlgmr.msra.gmra.mrb[0].mxu1 %v113_v14  ;;  %v2276_v14 = vld [vmem:[#allocation7 + $0xf4] ss:$8 sps:$4 sm:$0xff]  }
  0x8d   :  { %1621 = vmatmul.mubr.bf16.vlgmr.msra.gmra.mrb[0].mxu0 %v101_v15  ;;  %1503 = vmatpush1.bf16.msra.mxu1 %v2184_v12  ;;  %v2268_v12 = vld [vmem:[#allocation7 + $0xe0] ss:$8 sps:$4 sm:$0xff]   ;;  %v2279_v15 = vld [vmem:[#allocation7 + $0x3f4] ss:$8 sps:$4 sm:$0xff]  }
  0x8e   :  { %1632 = vmatpush1.bf16.msra.mxu0 %v2187_v13  ;;  %1504 = vmatprep.subr.bf16.mxu1 %v2192_v16  ;;  %v2271_v13 = vld [vmem:[#allocation7 + $0x3e0] ss:$8 sps:$4 sm:$0xff]   ;;  %v2274_v16 = vld [vmem:[#allocation7 + $0xf0] ss:$8 sps:$4 sm:$0xff]  }
  0x8f   :  { %1633 = vmatprep.subr.bf16.mxu0 %v2195_v17  ;;  %1534 = vmatprep.mubr.bf16.mxu1 %v98_v44  ;;  %v2277_v17 = vld [vmem:[#allocation7 + $0x3f0] ss:$8 sps:$4 sm:$0xff]  }
  0x90   :  { %1663 = vmatprep.mubr.bf16.mxu0 %v104_v47  ;;  %v2298_v44 = vld [vmem:[#allocation7 + $0x130] ss:$8 sps:$4 sm:$0xff]   ;;  %v2309_v47 = vld [vmem:[#allocation7 + $0x444] ss:$8 sps:$4 sm:$0xff]  }
  0x91   :  { %1505 = vmatpush1.bf16.msra.mxu1 %v2190_v18  ;;  %v73_v18 = vld [vmem:[#allocation2] sm:$0xff] }
  0x92   :  { %1634 = vmatpush1.bf16.msra.mxu0 %v2193_v19  ;;  %1506 = vmatprep.subr.bf16.mxu1 %v2198_v20  ;;  %v2282_v19 = vld [vmem:[#allocation7 + $0x104] ss:$8 sps:$4 sm:$0xff]  }
  0x93   :  { %1635 = vmatprep.subr.bf16.mxu0 %v2201_v21  ;;  %v85_v20 = vld [vmem:[#allocation2 + $0x60] sm:$0xff]  ;;  %v79_v21 = vld [vmem:[#allocation2 + $0x30] sm:$0xff] }
  0x95   :  { %1507 = vmatpush1.bf16.msra.mxu1 %v2196_v22  ;;  %v91_v22 = vld [vmem:[#allocation2 + $0x90] sm:$0xff] }
  0x96   :  { %1636 = vmatpush1.bf16.msra.mxu0 %v2199_v23  ;;  %1508 = vmatprep.subr.bf16.mxu1 %v2204_v24  ;;  %v2285_v23 = vld [vmem:[#allocation7 + $0x404] ss:$8 sps:$4 sm:$0xff]   ;;  %v2280_v24 = vld [vmem:[#allocation7 + $0x100] ss:$8 sps:$4 sm:$0xff]  }
  0x97   :  { %1637 = vmatprep.subr.bf16.mxu0 %v2207_v25  ;;  %v2283_v25 = vld [vmem:[#allocation7 + $0x400] ss:$8 sps:$4 sm:$0xff]  }
  0x99   :  { %1509 = vmatpush1.bf16.msra.mxu1 %v2202_v26  ;;  %v97_v26 = vpack.c.bf16 %v85_v20, %v73_v18  ;;  %v2360_v18 = vld [vmem:[#allocation7 + $0x1d4] ss:$8 sps:$4 sm:$0xff]   ;;  %v2358_v20 = vld [vmem:[#allocation7 + $0x1d0] ss:$8 sps:$4 sm:$0xff]  }
  0x9a   :  { %1638 = vmatpush1.bf16.msra.mxu0 %v2205_v27  ;;  %1510 = vmatprep.subr.bf16.mxu1 %v2210_v28  ;;  %v103_v27 = vpack.c.bf16 %v91_v22, %v79_v21  ;;  %v2288_v28 = vld [vmem:[#allocation7 + $0x114] ss:$8 sps:$4 sm:$0xff]   ;;  %v2361_v21 = vld [vmem:[#allocation7 + $0x4d0] ss:$8 sps:$4 sm:$0xff]   ;;  %v2366_v22 = vld [vmem:[#allocation7 + $0x1e4] ss:$8 sps:$4 sm:$0xff]  }
  0x9b   :  { %1639 = vmatprep.subr.bf16.mxu0 %v2213_v29  ;;  %v2291_v29 = vld [vmem:[#allocation7 + $0x414] ss:$8 sps:$4 sm:$0xff]  }
  0x9d   :  { %1511 = vmatpush1.bf16.msra.mxu1 %v2208_v30  ;;  %v2286_v30 = vld [vmem:[#allocation7 + $0x110] ss:$8 sps:$4 sm:$0xff]  }
  0x9e   :  { %1640 = vmatpush1.bf16.msra.mxu0 %v2211_v31  ;;  %1512 = vmatprep.subr.bf16.mxu1 %v2216_v32  ;;  %v2289_v31 = vld [vmem:[#allocation7 + $0x410] ss:$8 sps:$4 sm:$0xff]   ;;  %v2294_v32 = vld [vmem:[#allocation7 + $0x124] ss:$8 sps:$4 sm:$0xff]  }
  0x9f   :  { %1641 = vmatprep.subr.bf16.mxu0 %v2219_v33  ;;  %v2297_v33 = vld [vmem:[#allocation7 + $0x424] ss:$8 sps:$4 sm:$0xff]  }
  0xa1   :  { %1513 = vmatpush1.bf16.msra.mxu1 %v2214_v34  ;;  %v76_v34 = vld [vmem:[#allocation2 + $0x18] sm:$0xff] }
  0xa2   :  { %1642 = vmatpush1.bf16.msra.mxu0 %v2217_v35  ;;  %1514 = vmatprep.subr.bf16.mxu1 %v2222_v36  ;;  %v88_v35 = vld [vmem:[#allocation2 + $0x78] sm:$0xff] }
  0xa3   :  { %1643 = vmatprep.subr.bf16.mxu0 %v2225_v37  ;;  %v100_v36 = vpack.c.bf16 %v88_v35, %v76_v34  ;;  %v82_v37 = vld [vmem:[#allocation2 + $0x48] sm:$0xff]  ;;  %v84_v35 = vld [vmem:[#allocation2 + $0x58] sm:$0xff] }
  0xa4   :  { %v2378_v34 = vld [vmem:[#allocation7 + $0x504] ss:$8 sps:$4 sm:$0xff]  }
  0xa5   :  { %1515 = vmatpush1.bf16.msra.mxu1 %v2220_v38  ;;  %v94_v38 = vld [vmem:[#allocation2 + $0xa8] sm:$0xff] }
  0xa6   :  { %1644 = vmatpush1.bf16.msra.mxu0 %v2223_v39  ;;  %1516 = vmatprep.subr.bf16.mxu1 %v2228_v42  ;;  %v2292_v39 = vld [vmem:[#allocation7 + $0x120] ss:$8 sps:$4 sm:$0xff]   ;;  %v106_v42 = vpack.c.bf16 %v94_v38, %v82_v37 }
  0xa7   :  { %1645 = vmatprep.subr.bf16.mxu0 %v2231_v43  ;;  %v2303_v43 = vld [vmem:[#allocation7 + $0x434] ss:$8 sps:$4 sm:$0xff]  }
  0xa9   :  { %1517 = vmatpush1.bf16.msra.mxu1 %v2226_v48  ;;  %v2304_v48 = vld [vmem:[#allocation7 + $0x140] ss:$8 sps:$4 sm:$0xff]  }
  0xaa   :  { %1646 = vmatpush1.bf16.msra.mxu0 %v2229_v49  ;;  %1518 = vmatprep.subr.bf16.mxu1 %v2234_v50  ;;  %v2307_v49 = vld [vmem:[#allocation7 + $0x440] ss:$8 sps:$4 sm:$0xff]   ;;  %v2312_v50 = vld [vmem:[#allocation7 + $0x154] ss:$8 sps:$4 sm:$0xff]  }
  0xab   :  { %1647 = vmatprep.subr.bf16.mxu0 %v2237_v51  ;;  %v2315_v51 = vld [vmem:[#allocation7 + $0x454] ss:$8 sps:$4 sm:$0xff]  }
  0xad   :  { %1519 = vmatpush1.bf16.msra.mxu1 %v2232_v52  ;;  %v2310_v52 = vld [vmem:[#allocation7 + $0x150] ss:$8 sps:$4 sm:$0xff]  }
  0xae   :  { %1648 = vmatpush1.bf16.msra.mxu0 %v2235_v53  ;;  %1520 = vmatprep.subr.bf16.mxu1 %v2240_v54  ;;  %v2313_v53 = vld [vmem:[#allocation7 + $0x450] ss:$8 sps:$4 sm:$0xff]   ;;  %v2318_v54 = vld [vmem:[#allocation7 + $0x164] ss:$8 sps:$4 sm:$0xff]  }
  0xaf   :  { %1649 = vmatprep.subr.bf16.mxu0 %v2243_v55  ;;  %v2321_v55 = vld [vmem:[#allocation7 + $0x464] ss:$8 sps:$4 sm:$0xff]  }
  0xb1   :  { %1521 = vmatpush1.bf16.msra.mxu1 %v2238_v56  ;;  %v2316_v56 = vld [vmem:[#allocation7 + $0x160] ss:$8 sps:$4 sm:$0xff]  }
  0xb2   :  { %1650 = vmatpush1.bf16.msra.mxu0 %v2241_v57  ;;  %1522 = vmatprep.subr.bf16.mxu1 %v2246_v58  ;;  %v2319_v57 = vld [vmem:[#allocation7 + $0x460] ss:$8 sps:$4 sm:$0xff]   ;;  %v2324_v58 = vld [vmem:[#allocation7 + $0x174] ss:$8 sps:$4 sm:$0xff]  }
  0xb3   :  { %1651 = vmatprep.subr.bf16.mxu0 %v2249_v59  ;;  %v2327_v59 = vld [vmem:[#allocation7 + $0x474] ss:$8 sps:$4 sm:$0xff]  }
  0xb5   :  { %1523 = vmatpush1.bf16.msra.mxu1 %v2244_v60  ;;  %v2322_v60 = vld [vmem:[#allocation7 + $0x170] ss:$8 sps:$4 sm:$0xff]  }
  0xb6   :  { %1652 = vmatpush1.bf16.msra.mxu0 %v2247_v61  ;;  %1524 = vmatprep.subr.bf16.mxu1 %v2252_v62  ;;  %v2325_v61 = vld [vmem:[#allocation7 + $0x470] ss:$8 sps:$4 sm:$0xff]   ;;  %v2330_v62 = vld [vmem:[#allocation7 + $0x184] ss:$8 sps:$4 sm:$0xff]  }
  0xb7   :  { %1653 = vmatprep.subr.bf16.mxu0 %v2255_v63  ;;  %v2333_v63 = vld [vmem:[#allocation7 + $0x484] ss:$8 sps:$4 sm:$0xff]  }
  0xb9   :  { %1525 = vmatpush1.bf16.msra.mxu1 %v2250_v0  ;;  %v2328_v0 = vld [vmem:[#allocation7 + $0x180] ss:$8 sps:$4 sm:$0xff]  }
  0xba   :  { %1654 = vmatpush1.bf16.msra.mxu0 %v2253_v1  ;;  %1526 = vmatprep.subr.bf16.mxu1 %v2258_v2  ;;  %v2331_v1 = vld [vmem:[#allocation7 + $0x480] ss:$8 sps:$4 sm:$0xff]   ;;  %v2336_v2 = vld [vmem:[#allocation7 + $0x194] ss:$8 sps:$4 sm:$0xff]  }
  0xbb   :  { %1655 = vmatprep.subr.bf16.mxu0 %v2261_v3  ;;  %v2339_v3 = vld [vmem:[#allocation7 + $0x494] ss:$8 sps:$4 sm:$0xff]  }
  0xbd   :  { %1527 = vmatpush1.bf16.msra.mxu1 %v2256_v4  ;;  %v2334_v4 = vld [vmem:[#allocation7 + $0x190] ss:$8 sps:$4 sm:$0xff]  }
  0xbe   :  { %1656 = vmatpush1.bf16.msra.mxu0 %v2259_v5  ;;  %1528 = vmatprep.subr.bf16.mxu1 %v2264_v6  ;;  %v2337_v5 = vld [vmem:[#allocation7 + $0x490] ss:$8 sps:$4 sm:$0xff]   ;;  %v2342_v6 = vld [vmem:[#allocation7 + $0x1a4] ss:$8 sps:$4 sm:$0xff]  }
  0xbf   :  { %1657 = vmatprep.subr.bf16.mxu0 %v2267_v7  ;;  %v2345_v7 = vld [vmem:[#allocation7 + $0x4a4] ss:$8 sps:$4 sm:$0xff]  }
  0xc1   :  { %1529 = vmatpush1.bf16.msra.mxu1 %v2262_v8  ;;  %v2340_v8 = vld [vmem:[#allocation7 + $0x1a0] ss:$8 sps:$4 sm:$0xff]  }
  0xc2   :  { %1658 = vmatpush1.bf16.msra.mxu0 %v2265_v9  ;;  %1530 = vmatprep.subr.bf16.mxu1 %v2270_v10  ;;  %v2343_v9 = vld [vmem:[#allocation7 + $0x4a0] ss:$8 sps:$4 sm:$0xff]   ;;  %v2348_v10 = vld [vmem:[#allocation7 + $0x1b4] ss:$8 sps:$4 sm:$0xff]  }
  0xc3   :  { %1659 = vmatprep.subr.bf16.mxu0 %v2273_v11  ;;  %v2351_v11 = vld [vmem:[#allocation7 + $0x4b4] ss:$8 sps:$4 sm:$0xff]  }
  0xc5   :  { %1531 = vmatpush1.bf16.msra.mxu1 %v2268_v12  ;;  %v2346_v12 = vld [vmem:[#allocation7 + $0x1b0] ss:$8 sps:$4 sm:$0xff]  }
  0xc6   :  { %1660 = vmatpush1.bf16.msra.mxu0 %v2271_v13  ;;  %1532 = vmatprep.subr.bf16.mxu1 %v2276_v14  ;;  %v2349_v13 = vld [vmem:[#allocation7 + $0x4b0] ss:$8 sps:$4 sm:$0xff]   ;;  %v2354_v14 = vld [vmem:[#allocation7 + $0x1c4] ss:$8 sps:$4 sm:$0xff]  }
  0xc7   :  { %1661 = vmatprep.subr.bf16.mxu0 %v2279_v15  ;;  %v2357_v15 = vld [vmem:[#allocation7 + $0x4c4] ss:$8 sps:$4 sm:$0xff]  }
  0xc9   :  { %1533 = vmatpush1.bf16.msra.mxu1 %v2274_v16  ;;  %v2352_v16 = vld [vmem:[#allocation7 + $0x1c0] ss:$8 sps:$4 sm:$0xff]  }
  0xca   :  { %1662 = vmatpush1.bf16.msra.mxu0 %v2277_v17  ;;  %1545 = vmatprep.subr.bf16.mxu1 %v2282_v19  ;;  %v2355_v17 = vld [vmem:[#allocation7 + $0x4c0] ss:$8 sps:$4 sm:$0xff]   ;;  %v2363_v19 = vld [vmem:[#allocation7 + $0x4d4] ss:$8 sps:$4 sm:$0xff]  }
  0xcb   :  { %1674 = vmatprep.subr.bf16.mxu0 %v2285_v23  ;;  %v2369_v23 = vld [vmem:[#allocation7 + $0x4e4] ss:$8 sps:$4 sm:$0xff]  }
  0xcc   :  { %1535 = vmatmul.mubr.bf16.vlgmr.msra.gmra.mrb[0].mxu1 %v97_v26  ;;  %v2372_v26 = vld [vmem:[#allocation7 + $0x1f4] ss:$8 sps:$4 sm:$0xff]  }
  0xcd   :  { %1664 = vmatmul.mubr.bf16.vlgmr.msra.gmra.mrb[0].mxu0 %v103_v27  ;;  %1546 = vmatpush1.bf16.msra.mxu1 %v2280_v24  ;;  %v2364_v24 = vld [vmem:[#allocation7 + $0x1e0] ss:$8 sps:$4 sm:$0xff]   ;;  %v2375_v27 = vld [vmem:[#allocation7 + $0x4f4] ss:$8 sps:$4 sm:$0xff]  }
  0xce   :  { %1675 = vmatpush1.bf16.msra.mxu0 %v2283_v25  ;;  %1547 = vmatprep.subr.bf16.mxu1 %v2288_v28  ;;  %v2367_v25 = vld [vmem:[#allocation7 + $0x4e0] ss:$8 sps:$4 sm:$0xff]   ;;  %v2370_v28 = vld [vmem:[#allocation7 + $0x1f0] ss:$8 sps:$4 sm:$0xff]  }
  0xcf   :  { %1676 = vmatprep.subr.bf16.mxu0 %v2291_v29  ;;  %1577 = vmatprep.mubr.bf16.mxu1 %v100_v36  ;;  %v2373_v29 = vld [vmem:[#allocation7 + $0x4f0] ss:$8 sps:$4 sm:$0xff]  }
  0xd0   :  { %1706 = vmatprep.mubr.bf16.mxu0 %v106_v42  ;;  %v96_v36 = vld [vmem:[#allocation2 + $0xb8] sm:$0xff] }
  0xd1   :  { %1548 = vmatpush1.bf16.msra.mxu1 %v2286_v30  ;;  %v75_v30 = vld [vmem:[#allocation2 + $0x10] sm:$0xff] }
  0xd2   :  { %1677 = vmatpush1.bf16.msra.mxu0 %v2289_v31  ;;  %1549 = vmatprep.subr.bf16.mxu1 %v2294_v32  ;;  %v87_v31 = vld [vmem:[#allocation2 + $0x70] sm:$0xff]  ;;  %v81_v32 = vld [vmem:[#allocation2 + $0x40] sm:$0xff] }
  0xd3   :  { %1678 = vmatprep.subr.bf16.mxu0 %v2297_v33  ;;  %v93_v33 = vld [vmem:[#allocation2 + $0xa0] sm:$0xff]  ;;  %v99_v37 = vpack.c.bf16 %v87_v31, %v75_v30  ;;  %v2379_v42 = vld [vmem:[#allocation7 + $0x510] ss:$8 sps:$4 sm:$0xff]  }
  0xd4   :  { %v105_v38 = vpack.c.bf16 %v93_v33, %v81_v32 }
  0xd5   :  { %1550 = vmatpush1.bf16.msra.mxu1 %v2292_v39  ;;  %v2376_v39 = vld [vmem:[#allocation7 + $0x500] ss:$8 sps:$4 sm:$0xff]  }
  0xd6   :  { %1679 = vmatpush1.bf16.msra.mxu0 %v2295_v40  ;;  %1551 = vmatprep.subr.bf16.mxu1 %v2300_v41  ;;  %v108_v40 = vpack.c.bf16 %v96_v36, %v84_v35  ;;  %v2381_v41 = vld [vmem:[#allocation7 + $0x514] ss:$8 sps:$4 sm:$0xff]  }
  0xd7   :  { %1680 = vmatprep.subr.bf16.mxu0 %v2303_v43  ;;  %v2384_v43 = vld [vmem:[#allocation7 + $0x524] ss:$8 sps:$4 sm:$0xff]  }
  0xd9   :  { %1552 = vmatpush1.bf16.msra.mxu1 %v2298_v44  ;;  %v2382_v44 = vld [vmem:[#allocation7 + $0x520] ss:$8 sps:$4 sm:$0xff]  }
  0xda   :  { %1681 = vmatpush1.bf16.msra.mxu0 %v2301_v45  ;;  %1553 = vmatprep.subr.bf16.mxu1 %v2306_v46  ;;  %v2387_v45 = vld [vmem:[#allocation7 + $0x534] ss:$8 sps:$4 sm:$0xff]   ;;  %v2385_v46 = vld [vmem:[#allocation7 + $0x530] ss:$8 sps:$4 sm:$0xff]  }
  0xdb   :  { %1682 = vmatprep.subr.bf16.mxu0 %v2309_v47  ;;  %v2390_v47 = vld [vmem:[#allocation7 + $0x544] ss:$8 sps:$4 sm:$0xff]  }
  0xdd   :  { %1554 = vmatpush1.bf16.msra.mxu1 %v2304_v48  ;;  %v2388_v48 = vld [vmem:[#allocation7 + $0x540] ss:$8 sps:$4 sm:$0xff]  }
  0xde   :  { %1683 = vmatpush1.bf16.msra.mxu0 %v2307_v49  ;;  %1555 = vmatprep.subr.bf16.mxu1 %v2312_v50  ;;  %v2393_v49 = vld [vmem:[#allocation7 + $0x554] ss:$8 sps:$4 sm:$0xff]   ;;  %v2391_v50 = vld [vmem:[#allocation7 + $0x550] ss:$8 sps:$4 sm:$0xff]  }
  0xdf   :  { %1684 = vmatprep.subr.bf16.mxu0 %v2315_v51  ;;  %v2396_v51 = vld [vmem:[#allocation7 + $0x564] ss:$8 sps:$4 sm:$0xff]  }
  0xe1   :  { %1556 = vmatpush1.bf16.msra.mxu1 %v2310_v52  ;;  %v2394_v52 = vld [vmem:[#allocation7 + $0x560] ss:$8 sps:$4 sm:$0xff]  }
  0xe2   :  { %1685 = vmatpush1.bf16.msra.mxu0 %v2313_v53  ;;  %1557 = vmatprep.subr.bf16.mxu1 %v2318_v54  ;;  %v2399_v53 = vld [vmem:[#allocation7 + $0x574] ss:$8 sps:$4 sm:$0xff]   ;;  %v2397_v54 = vld [vmem:[#allocation7 + $0x570] ss:$8 sps:$4 sm:$0xff]  }
  0xe3   :  { %1686 = vmatprep.subr.bf16.mxu0 %v2321_v55  ;;  %v2402_v55 = vld [vmem:[#allocation7 + $0x584] ss:$8 sps:$4 sm:$0xff]  }
  0xe5   :  { %1558 = vmatpush1.bf16.msra.mxu1 %v2316_v56  ;;  %v2400_v56 = vld [vmem:[#allocation7 + $0x580] ss:$8 sps:$4 sm:$0xff]  }
  0xe6   :  { %1687 = vmatpush1.bf16.msra.mxu0 %v2319_v57  ;;  %1559 = vmatprep.subr.bf16.mxu1 %v2324_v58  ;;  %v2405_v57 = vld [vmem:[#allocation7 + $0x594] ss:$8 sps:$4 sm:$0xff]   ;;  %v2403_v58 = vld [vmem:[#allocation7 + $0x590] ss:$8 sps:$4 sm:$0xff]  }
  0xe7   :  { %1688 = vmatprep.subr.bf16.mxu0 %v2327_v59  ;;  %v2408_v59 = vld [vmem:[#allocation7 + $0x5a4] ss:$8 sps:$4 sm:$0xff]  }
  0xe9   :  { %1560 = vmatpush1.bf16.msra.mxu1 %v2322_v60  ;;  %v2406_v60 = vld [vmem:[#allocation7 + $0x5a0] ss:$8 sps:$4 sm:$0xff]  }
  0xea   :  { %1689 = vmatpush1.bf16.msra.mxu0 %v2325_v61  ;;  %1561 = vmatprep.subr.bf16.mxu1 %v2330_v62  ;;  %v2411_v61 = vld [vmem:[#allocation7 + $0x5b4] ss:$8 sps:$4 sm:$0xff]   ;;  %v2409_v62 = vld [vmem:[#allocation7 + $0x5b0] ss:$8 sps:$4 sm:$0xff]  }
  0xeb   :  { %1690 = vmatprep.subr.bf16.mxu0 %v2333_v63  ;;  %v2414_v63 = vld [vmem:[#allocation7 + $0x5c4] ss:$8 sps:$4 sm:$0xff]  }
  0xed   :  { %1562 = vmatpush1.bf16.msra.mxu1 %v2328_v0  ;;  %v2412_v0 = vld [vmem:[#allocation7 + $0x5c0] ss:$8 sps:$4 sm:$0xff]  }
  0xee   :  { %1691 = vmatpush1.bf16.msra.mxu0 %v2331_v1  ;;  %1563 = vmatprep.subr.bf16.mxu1 %v2336_v2  ;;  %v2417_v1 = vld [vmem:[#allocation7 + $0x5d4] ss:$8 sps:$4 sm:$0xff]   ;;  %v2415_v2 = vld [vmem:[#allocation7 + $0x5d0] ss:$8 sps:$4 sm:$0xff]  }
  0xef   :  { %1692 = vmatprep.subr.bf16.mxu0 %v2339_v3  ;;  %v2420_v3 = vld [vmem:[#allocation7 + $0x5e4] ss:$8 sps:$4 sm:$0xff]  }
  0xf1   :  { %1564 = vmatpush1.bf16.msra.mxu1 %v2334_v4  ;;  %v2418_v4 = vld [vmem:[#allocation7 + $0x5e0] ss:$8 sps:$4 sm:$0xff]  }
  0xf2   :  { %1693 = vmatpush1.bf16.msra.mxu0 %v2337_v5  ;;  %1565 = vmatprep.subr.bf16.mxu1 %v2342_v6  ;;  %v2423_v5 = vld [vmem:[#allocation7 + $0x5f4] ss:$8 sps:$4 sm:$0xff]   ;;  %v2421_v6 = vld [vmem:[#allocation7 + $0x5f0] ss:$8 sps:$4 sm:$0xff]  }
  0xf3   :  { %1694 = vmatprep.subr.bf16.mxu0 %v2345_v7  ;;  %v83_v7 = vld [vmem:[#allocation2 + $0x50] sm:$0xff] }
  0xf5   :  { %1566 = vmatpush1.bf16.msra.mxu1 %v2340_v8  ;;  %v95_v8 = vld [vmem:[#allocation2 + $0xb0] sm:$0xff] }
  0xf6   :  { %1695 = vmatpush1.bf16.msra.mxu0 %v2343_v9  ;;  %1567 = vmatprep.subr.bf16.mxu1 %v2348_v10  ;;  %v107_v9 = vpack.c.bf16 %v95_v8, %v83_v7 }
  0xf7   :  { %1696 = vmatprep.subr.bf16.mxu0 %v2351_v11 }
  0xf9   :  { %1568 = vmatpush1.bf16.msra.mxu1 %v2346_v12 }
  0xfa   :  { %1697 = vmatpush1.bf16.msra.mxu0 %v2349_v13  ;;  %1569 = vmatprep.subr.bf16.mxu1 %v2354_v14 }
  0xfb   :  { %1698 = vmatprep.subr.bf16.mxu0 %v2357_v15 }
  0xfd   :  { %1570 = vmatpush1.bf16.msra.mxu1 %v2352_v16 }
  0xfe   :  { %1699 = vmatpush1.bf16.msra.mxu0 %v2355_v17  ;;  %1571 = vmatprep.subr.bf16.mxu1 %v2360_v18 }
  0xff   :  { %1700 = vmatprep.subr.bf16.mxu0 %v2363_v19 }
 0x101   :  { %1572 = vmatpush1.bf16.msra.mxu1 %v2358_v20 }
 0x102   :  { %1701 = vmatpush1.bf16.msra.mxu0 %v2361_v21  ;;  %1573 = vmatprep.subr.bf16.mxu1 %v2366_v22 }
 0x103   :  { %1702 = vmatprep.subr.bf16.mxu0 %v2369_v23 }
 0x105   :  { %1574 = vmatpush1.bf16.msra.mxu1 %v2364_v24 }
 0x106   :  { %1703 = vmatpush1.bf16.msra.mxu0 %v2367_v25  ;;  %1575 = vmatprep.subr.bf16.mxu1 %v2372_v26 }
 0x107   :  { %1704 = vmatprep.subr.bf16.mxu0 %v2375_v27 }
 0x109   :  { %1576 = vmatpush1.bf16.msra.mxu1 %v2370_v28 }
 0x10a   :  { %1705 = vmatpush1.bf16.msra.mxu0 %v2373_v29 }
 0x10b   :  { %1717 = vmatprep.subr.bf16.mxu0 %v2378_v34 }
 0x10c   :  { %1578 = vmatmul.mubr.bf16.vlgmr.msra.gmra.mrb[0].mxu1 %v99_v37 }
 0x10d   :  { %1707 = vmatmul.mubr.bf16.vlgmr.msra.gmra.mrb[0].mxu0 %v105_v38 }
 0x10e   :  { %1718 = vmatpush1.bf16.msra.mxu0 %v2376_v39  ;;  %1749 = vmatprep.mubr.bf16.mxu0 %v108_v40  ;;  %v1796_v40 = vlaneseq }
 0x10f   :  { %1719 = vmatprep.subr.bf16.mxu0 %v2381_v41 }
 0x112   :  { %1720 = vmatpush1.bf16.msra.mxu0 %v2379_v42  ;;  %v1797_v42 = vand.u32 127, %v1796_v40 }
 0x113   :  { %1721 = vmatprep.subr.bf16.mxu0 %v2384_v43 }
 0x116   :  { %1722 = vmatpush1.bf16.msra.mxu0 %v2382_v44 }
 0x117   :  { %1723 = vmatprep.subr.bf16.mxu0 %v2387_v45  ;;  %v1799_v45 = vshrl.u32 %v1796_v40, 7 }
 0x11a   :  { %1724 = vmatpush1.bf16.msra.mxu0 %v2385_v46  ;;  %v1802_v46 = vadd.s32 4294967288, %v1797_v42 }
 0x11b   :  { %1725 = vmatprep.subr.bf16.mxu0 %v2390_v47 }
 0x11e   :  { %1726 = vmatpush1.bf16.msra.mxu0 %v2388_v48 }
 0x11f   :  { %1727 = vmatprep.subr.bf16.mxu0 %v2393_v49 }
 0x122   :  { %1728 = vmatpush1.bf16.msra.mxu0 %v2391_v50  ;;  %v1800_v50 = vsub.s32 %v1797_v42, %v1799_v45 }
 0x123   :  { %1729 = vmatprep.subr.bf16.mxu0 %v2396_v51 }
 0x126   :  { %1730 = vmatpush1.bf16.msra.mxu0 %v2394_v52 }
 0x127   :  { %1731 = vmatprep.subr.bf16.mxu0 %v2399_v53  ;;  %v1805_v53 = vsub.s32 %v1802_v46, %v1799_v45 }
 0x12a   :  { %1732 = vmatpush1.bf16.msra.mxu0 %v2397_v54 }
 0x12b   :  { %1733 = vmatprep.subr.bf16.mxu0 %v2402_v55 }
 0x12e   :  { %1734 = vmatpush1.bf16.msra.mxu0 %v2400_v56 }
 0x12f   :  { %1735 = vmatprep.subr.bf16.mxu0 %v2405_v57 }
 0x132   :  { %1736 = vmatpush1.bf16.msra.mxu0 %v2403_v58 }
 0x133   :  { %1737 = vmatprep.subr.bf16.mxu0 %v2408_v59 }
 0x136   :  { %1738 = vmatpush1.bf16.msra.mxu0 %v2406_v60 }
 0x137   :  { %1739 = vmatprep.subr.bf16.mxu0 %v2411_v61 }
 0x13a   :  { %1740 = vmatpush1.bf16.msra.mxu0 %v2409_v62 }
 0x13b   :  { %1741 = vmatprep.subr.bf16.mxu0 %v2414_v63 }
 0x13e   :  { %1742 = vmatpush1.bf16.msra.mxu0 %v2412_v0 }
 0x13f   :  { %1743 = vmatprep.subr.bf16.mxu0 %v2417_v1 }
 0x142   :  { %1744 = vmatpush1.bf16.msra.mxu0 %v2415_v2 }
 0x143   :  { %1745 = vmatprep.subr.bf16.mxu0 %v2420_v3 }
 0x146   :  { %1746 = vmatpush1.bf16.msra.mxu0 %v2418_v4 }
 0x147   :  { %1747 = vmatprep.subr.bf16.mxu0 %v2423_v5 }
 0x14a   :  { %1748 = vmatpush1.bf16.msra.mxu0 %v2421_v6 }
 0x14d   :  { %1750 = vmatmul.mubr.bf16.vlgmr.msra.gmra.mrb[0].mxu0 %v107_v9 }
 0x1df   :  { %v1579_v10 = vpop.f32.mrb[0].mxu1 }
 0x1e0   :  { %v1581_v11 = vpop.f32.mrb[1].mxu1 }
 0x1e1   :  { %v1583_v12 = vpop.f32.mrb[2].mxu1 }
 0x1e2   :  { %v1585_v13 = vpop.f32.mrb[3].mxu1 }
 0x220   :  { %v1751_v14 = vpop.f32.mrb[0].mxu0 }
 0x221   :  { %v2053_v15 = vadd.f32 %v1751_v14, %v1579_v10  ;;  %v1753_v16 = vpop.f32.mrb[1].mxu0 }
 0x222   :  { %v2054_v17 = vadd.f32 %v1753_v16, %v1581_v11  ;;  %v1755_v18 = vpop.f32.mrb[2].mxu0 }
 0x223   :  { %v1760_v19 = vmax.f32 %v2053_v15, 0.0  ;;  %v2055_v20 = vadd.f32 %v1755_v18, %v1583_v12  ;;  %v1757_v21 = vpop.f32.mrb[3].mxu0 }
 0x224   :  { %v1762_v22 = vmax.f32 %v2054_v17, 0.0  ;;  %v2056_v23 = vadd.f32 %v1757_v21, %v1585_v13 }
 0x225   :  { %v1761_v24 = vmax.f32 %v2055_v20, 0.0  ;;  %v1764_v25 = vmul.f32 %v1760_v19, %v1760_v19 }
 0x226   :  { %v1763_v26 = vmax.f32 %v2056_v23, 0.0  ;;  %v1770_v27 = vmul.f32 %v1762_v22, %v1762_v22  ;;  %v1776_v28 = vmul.f32 %v1762_v22, %v1760_v19 }
 0x227   :  { %1766 = vadd.xlane.f32.xlu0 %v1764_v25  ;;  %v1765_v30 = vmul.f32 %v1761_v24, %v1761_v24 }
 0x228   :  { %1772 = vadd.xlane.f32.xlu1 %v1770_v27  ;;  %v1777_v29 = vmul.f32 %v1763_v26, %v1761_v24  ;;  %v1771_v31 = vmul.f32 %v1763_v26, %v1763_v26 }
 0x22b   :  { %1768 = vadd.xlane.f32.xlu0 %v1765_v30 }
 0x22c   :  { %1774 = vadd.xlane.f32.xlu1 %v1771_v31 }
 0x22f   :  { %1778 = vadd.xlane.f32.xlu0 %v1776_v28 }
 0x230   :  { %1780 = vadd.xlane.f32.xlu1 %v1777_v29 }
 0x2b4   :  { %v1767_v32 = vpop.xlane.xlu0 %1766 }
 0x2b5   :  { %v1782_v33 = vmax.f32 %v1767_v32, 1e-24  ;;  %v1773_v34 = vpop.xlane.xlu1 %1772 }
 0x2b6   :  { %v1786_v35 = vmax.f32 %v1773_v34, 1e-24 }
 0x2b7   :  { %2424 = vrsqrt.f32 %v1782_v33 }
 0x2b8   :  { %2426 = vrsqrt.f32 %v1786_v35  ;;  %v1769_v36 = vpop.xlane.xlu0 %1768 }
 0x2b9   :  { %v1783_v37 = vmax.f32 %v1769_v36, 1e-24  ;;  %v1775_v38 = vpop.xlane.xlu1 %1774 }
 0x2ba   :  { %v1787_v39 = vmax.f32 %v1775_v38, 1e-24 }
 0x2bb   :  { %2428 = vrsqrt.f32 %v1783_v37 }
 0x2bc   :  { %2430 = vrsqrt.f32 %v1787_v39  ;;  %v1779_v49 = vpop.xlane.xlu0 %1778 }
 0x2bd   :  { %v1781_v54 = vpop.xlane.xlu1 %1780 }
 0x2c1   :  { %v2425_v41 = vpop.eup %2424 }
 0x2c2   :  { %v2427_v43 = vpop.eup %2426 }
 0x2c3   :  { %v1790_v44 = vmul.f32 %v2427_v43, %v2425_v41 }
 0x2c5   :  { %v2429_v47 = vpop.eup %2428  ;;  %v1792_v51 = vmul.f32 %v1790_v44, %v1779_v49 }
 0x2c6   :  { %v2431_v48 = vpop.eup %2430 }
 0x2c7   :  { %v1791_v52 = vmul.f32 %v2431_v48, %v2429_v47  ;;  %v1801_v56 = vrot.slane %v1792_v51, %v1800_v50 }
 0x2c9   :  { %v1793_v55 = vmul.f32 %v1791_v52, %v1781_v54 }
 0x2cb   :  { %v1806_v57 = vrot.slane %v1793_v55, %v1805_v53 }
 0x2cd   :  { %v1808_v58 = vsel %vm1807_vm0, %v1806_v57, %v1801_v56 }
 0x2ce   :  { %1811 = vst.msk [vmem:[#allocation10] sm:$0x1] %vm1810_vm1, %v1808_v58 }
 0x2cf   :  { %2531 = shalt.err (!%p2528_p8)
}
 0x2d0   :  { %s2532_s18 = scalar_lea.hbm %s2650_s4, 16 }
 0x2d1   :  { %p2533_p9 = scmp.ne.s32.totalorder %s2650_s4, %s2532_s18  ;;  %p2536_p10 = scmp.lt.u32.totalorder %s2532_s18, %s2650_s4 }
 0x2d3   :  { %p2538_p11 = pnand %p2536_p10, %p2533_p9 }
 0x2d5   :  { %2541 = shalt.err (!%p2538_p11)
}
 0x2d6   :  { %1821 = dma.vmem_to_hbm [thread:$0]  %s1819_s13, 16, %s2650_s4, [#allocation4]  }
 0x2d7   :  { %2548 = dma.done.wait [#allocation4], 16  }
 0x2d8   :  { %2549 = vsyncadd [#allocation4], 4294967280 }
 0x2d9   :  { %1825 = vsyncpa [#allocation3], 1 }
 0x2da   :  { %1826 = vsyncpa [#allocation6], 1 }
 0x2db   :  { %1827 = vsyncpa [#allocation9], 1 }
 0x2dc   :  { %1828 = vsyncpa [#allocation4], 1 }

</bundles_post_ra>
